<compile_context>
chip_gen: v7x
topology: tpu7x:2x2x1
jax: 0.10.0
libtpu: 0.0.40
codegen_flags: <defaults>
</compile_context>

<pallas_src>
import functools

import jax
import jax.numpy as jnp
from jax import lax
from jax.experimental import pallas as pl
from jax.experimental.pallas import tpu as pltpu

LANES = 128      # vreg lane width (last-dim tiling)
SUBLANES = 8     # vreg sublane count
# ~2 MiB of combined (preds + labels) HBM bytes per grid step: amortizes the
# ~0.35us per-step overhead while keeping double-buffered VMEM use at ~4 MiB.
TARGET_BLOCK_BYTES = 2 * 1024 * 1024


def _accumulate(o_ref, valid_f, contrib, tile_rows):
    """Adds this step's partial sums into the core-resident accumulator block.

    o_ref block shape: (1, 2, 8, LANES)
      [0, 0] += per-(sublane,lane) count of valid labels
      [0, 1] += per-(sublane,lane) sum of nan_to_zero((p-l)^2) at valid labels
    """
    if tile_rows % SUBLANES == 0:
        # Elementwise vreg-tree adds only; dense (8,128) read-modify-write.
        o_ref[0, 0, :, :] += jnp.sum(
            valid_f.reshape(-1, SUBLANES, LANES), axis=0)
        o_ref[0, 1, :, :] += jnp.sum(
            contrib.reshape(-1, SUBLANES, LANES), axis=0)
    else:
        # Small-tensor fallback (single block whose row count isn't a multiple
        # of 8): accumulate into sublane 0 only.
        o_ref[0, 0, 0, :] += jnp.sum(valid_f, axis=0)
        o_ref[0, 1, 0, :] += jnp.sum(contrib, axis=0)


def _masked_rmse_kernel(p_ref, l_ref, o_ref, *, tile_rows, total_rows,
                        blocks_per_core):
    c = pl.program_id(0)   # core axis (parallel)
    i = pl.program_id(1)   # sequential reduction axis

    @pl.when(i == 0)
    def _():
        o_ref[...] = jnp.zeros(o_ref.shape, o_ref.dtype)

    # Unclamped global block id.  The index_map clamps the DMA so it stays in
    # bounds; here we use the unclamped id so rows past the end of the array
    # (partial last block, or the clamped duplicate block on an extra core
    # step) are routed to the masked path and contribute exactly zero.
    g = c * blocks_per_core + i
    row_start = g * tile_rows

    labels = l_ref[...].astype(jnp.float32)   # in-register upcast (bf16 ok)
    preds = p_ref[...].astype(jnp.float32)
    diff = preds - labels
    sq = diff * diff

    fully_in_range = row_start + tile_rows <= total_rows

    @pl.when(fully_in_range)
    def _():
        # Fast path: no iota / row mask.
        valid = jnp.logical_not(jnp.isnan(labels))
        # isnan(sq) reproduces torch.where(isnan(loss), 0, loss): drops NaN
        # from NaN preds / inf-inf at valid labels; keeps +inf.
        contrib = jnp.where(valid & jnp.logical_not(jnp.isnan(sq)), sq, 0.0)
        _accumulate(o_ref, valid.astype(jnp.float32), contrib, tile_rows)

    @pl.when(jnp.logical_not(fully_in_range))
    def _():
        # Rare path: last partial block / clamped duplicate block.
        row_ids = row_start + lax.broadcasted_iota(
            jnp.int32, (tile_rows, LANES), 0)
        in_range = row_ids < total_rows
        valid = in_range & jnp.logical_not(jnp.isnan(labels))
        contrib = jnp.where(valid & jnp.logical_not(jnp.isnan(sq)), sq, 0.0)
        _accumulate(o_ref, valid.astype(jnp.float32), contrib, tile_rows)


def masked_rmse(preds, labels, *, num_cores=1):
    """sqrt(mean(masked loss)) exactly as the PyTorch MaskedRMSE forward.

    num_cores=1 is correct everywhere; num_cores=2 enables CORE_PARALLEL on
    the leading grid axis to engage both TensorCores on v7x.
    """
    assert preds.shape == labels.shape
    n = preds.size

    p_flat = preds.reshape(-1)   # free reshape of contiguous data
    l_flat = labels.reshape(-1)

    rem = n % LANES
    n_aligned = n - rem

    s_mask = jnp.float32(0.0)
    s_loss = jnp.float32(0.0)

    if n_aligned:
        rows = n_aligned // LANES
        p2 = p_flat[:n_aligned].reshape(rows, LANES)
        l2 = l_flat[:n_aligned].reshape(rows, LANES)

        # Scale rows-per-block with dtype so each streamed block stays ~2 MiB
        # of combined HBM bytes (f32+f32 -> 2048 rows, bf16+bf16 -> 4096).
        bytes_per_row = LANES * (preds.dtype.itemsize + labels.dtype.itemsize)
        tile_rows = max(TARGET_BLOCK_BYTES // bytes_per_row, SUBLANES)
        tile_rows -= tile_rows % SUBLANES
        tile_eff = min(tile_rows, rows)   # full extent for small tensors
        nblocks = pl.cdiv(rows, tile_eff)
        bpc = pl.cdiv(nblocks, num_cores)   # sequential steps per core

        kernel = functools.partial(
            _masked_rmse_kernel,
            tile_rows=tile_eff, total_rows=rows, blocks_per_core=bpc)

        def in_map(c, i):
            # Clamp so the DMA never targets a fully out-of-range block; the
            # kernel's masked path zeroes any duplicated / OOB rows.
            return (jnp.minimum(c * bpc + i, nblocks - 1), 0)

        if num_cores > 1:
            # Only CORE_PARALLEL actually shards a grid axis across TCs.
            semantics = (pltpu.CORE_PARALLEL, pltpu.ARBITRARY)
        else:
            semantics = (pltpu.ARBITRARY, pltpu.ARBITRARY)

        sums = pl.pallas_call(
            kernel,
            out_shape=jax.ShapeDtypeStruct(
                (num_cores, 2, SUBLANES, LANES), jnp.float32),
            grid_spec=pltpu.PrefetchScalarGridSpec(
                num_scalar_prefetch=0,
                grid=(num_cores, bpc),
                in_specs=[
                    pl.BlockSpec((tile_eff, LANES), in_map),
                    pl.BlockSpec((tile_eff, LANES), in_map),
                ],
                # Each core owns one resident (1,2,8,LANES) accumulator block
                # across the sequential axis.
                out_specs=pl.BlockSpec((1, 2, SUBLANES, LANES),
                                       lambda c, i: (c, 0, 0, 0)),
            ),
            compiler_params=pltpu.CompilerParams(
                dimension_semantics=semantics),
        )(p2, l2)

        s_mask = s_mask + jnp.sum(sums[:, 0])
        s_loss = s_loss + jnp.sum(sums[:, 1])

    if rem:
        # <128-element tail handled in glue (contiguous slice, no copy).
        tp = p_flat[n_aligned:].astype(jnp.float32)
        tl = l_flat[n_aligned:].astype(jnp.float32)
        tvalid = jnp.logical_not(jnp.isnan(tl))
        tsq = (tp - tl) * (tp - tl)
        tcontrib = jnp.where(tvalid & jnp.logical_not(jnp.isnan(tsq)), tsq, 0.0)
        s_mask = s_mask + jnp.sum(tvalid.astype(jnp.float32))
        s_loss = s_loss + jnp.sum(tcontrib)

    # All-NaN labels: torch path yields mean(loss)=0 -> sqrt(0)=0.
    mean_loss = jnp.where(s_mask > 0, s_loss / jnp.maximum(s_mask, 1.0), 0.0)
    return jnp.sqrt(mean_loss)


def _reference_masked_rmse(preds, labels):
    """Direct transliteration of the PyTorch forward (for verification)."""
    preds = preds.astype(jnp.float32)
    labels = labels.astype(jnp.float32)
    mask = (~jnp.isnan(labels)).astype(jnp.float32)
    mask = mask / jnp.mean(mask)
    mask = jnp.where(jnp.isnan(mask), jnp.zeros_like(mask), mask)
    loss = (preds - labels) ** 2
    loss = loss * mask
    loss = jnp.where(jnp.isnan(loss), jnp.zeros_like(loss), loss)
    return jnp.sqrt(jnp.mean(loss))


if __name__ == "__main__":
    key = jax.random.PRNGKey(0)

    def make_case(subkey, shape, nan_frac, dtype=jnp.float32):
        kp, kl, km = jax.random.split(subkey, 3)
        p = jax.random.normal(kp, shape, dtype=jnp.float32).astype(dtype)
        l = jax.random.normal(kl, shape, dtype=jnp.float32).astype(dtype)
        l = jnp.where(jax.random.uniform(km, shape) < nan_frac,
                      jnp.array(jnp.nan, dtype), l)
        return p, l

    # Case 1: traffic-forecasting-like tensor; numel % 128 == 0, single block.
    p1, l1 = make_case(jax.random.fold_in(key, 1), (2, 4, 16, 16), 0.2)
    out1 = jax.block_until_ready(masked_rmse(p1, l1))
    ref1 = _reference_masked_rmse(p1, l1)
    assert jnp.allclose(out1, ref1, rtol=1e-5, atol=1e-6), (out1, ref1)

    # Case 2: odd shape (numel % 128 != 0, rows % 8 != 0) -> glue tail path +
    # small-tensor sublane-0 accumulator fallback.
    p2, l2 = make_case(jax.random.fold_in(key, 2), (2, 3, 17, 13), 0.3)
    out2 = jax.block_until_ready(masked_rmse(p2, l2))
    ref2 = _reference_masked_rmse(p2, l2)
    assert jnp.allclose(out2, ref2, rtol=1e-5, atol=1e-6), (out2, ref2)

    # Case 3: all-NaN labels edge case -> 0.
    p3, _ = make_case(jax.random.fold_in(key, 3), (2, 4, 8, 4), 0.0)
    l3 = jnp.full(p3.shape, jnp.nan, p3.dtype)
    out3 = jax.block_until_ready(masked_rmse(p3, l3))
    ref3 = _reference_masked_rmse(p3, l3)
    assert jnp.allclose(out3, ref3, rtol=1e-5, atol=1e-6), (out3, ref3)

    # Case 4: f32 multi-block stream with a partial last block (rows=2064,
    # tile=2048) to exercise the masked-path gating.
    p4, l4 = make_case(jax.random.fold_in(key, 4), (4, 8, 129, 64), 0.25)
    out4 = jax.block_until_ready(masked_rmse(p4, l4))
    ref4 = _reference_masked_rmse(p4, l4)
    assert jnp.allclose(out4, ref4, rtol=1e-5, atol=1e-6), (out4, ref4)

    # Case 5: bf16 inputs, multi-block (rows=4128 > bf16 tile of 4096) with a
    # partial last block; exercises native-dtype streaming + dtype tile scale.
    p5, l5 = make_case(jax.random.fold_in(key, 5), (8, 8, 129, 64), 0.2,
                       dtype=jnp.bfloat16)
    out5 = jax.block_until_ready(masked_rmse(p5, l5))
    ref5 = _reference_masked_rmse(p5, l5)
    assert jnp.allclose(out5, ref5, rtol=1e-4, atol=1e-6), (out5, ref5)

    print("KERNEL_OK")
</pallas_src>

<mosaic_0001>
module attributes {stable_mosaic.version = 11 : i64} {
  func.func @_masked_rmse_kernel(%arg0: i32, %arg1: i32, %arg2: memref<16x128xf32, #tpu.memory_space<vmem>>, %arg3: memref<16x128xf32, #tpu.memory_space<vmem>>, %arg4: memref<1x2x8x128xf32, #tpu.memory_space<vmem>>) attributes {dimension_semantics = [#tpu.dimension_semantics<arbitrary>, #tpu.dimension_semantics<arbitrary>], iteration_bounds = array<i64: 1, 1>, scalar_prefetch = 0 : i64, scratch_operands = 0 : i64, tpu.core_type = #tpu.core_type<tc>, window_params = [{transform_indices = @transform_0, window_bounds = array<i64: 16, 128>}, {transform_indices = @transform_1, window_bounds = array<i64: 16, 128>}, {transform_indices = @transform_2, window_bounds = array<i64: 1, 2, 8, 128>}]} {
    %c0_i32 = arith.constant 0 : i32
    %0 = arith.cmpi eq, %arg1, %c0_i32 : i32
    %1 = arith.extui %0 : i1 to i32
    %c0_i32_0 = arith.constant 0 : i32
    %2 = arith.cmpi ne, %1, %c0_i32_0 : i32
    scf.if %2 {
      %cst = arith.constant 0.000000e+00 : f32
      %17 = vector.broadcast %cst : f32 to vector<1x2x8x128xf32>
      %c0_8 = arith.constant 0 : index
      %c0_9 = arith.constant 0 : index
      %c0_10 = arith.constant 0 : index
      %c0_11 = arith.constant 0 : index
      %18 = vector.load %arg4[%c0_8, %c0_9, %c0_10, %c0_11] : memref<1x2x8x128xf32, #tpu.memory_space<vmem>>, vector<1x2x8x128xf32>
      tpu.vector_store %arg4[%c0_8, %c0_9, %c0_10, %c0_11], %17 {strides = array<i32>} : memref<1x2x8x128xf32, #tpu.memory_space<vmem>>, vector<1x2x8x128xf32>,
    } else {
    }
    %c1_i32 = arith.constant 1 : i32
    %3 = arith.muli %arg0, %c1_i32 : i32
    %4 = arith.addi %3, %arg1 : i32
    %c16_i32 = arith.constant 16 : i32
    %5 = arith.muli %4, %c16_i32 : i32
    %c0 = arith.constant 0 : index
    %c0_1 = arith.constant 0 : index
    %6 = vector.load %arg3[%c0, %c0_1] : memref<16x128xf32, #tpu.memory_space<vmem>>, vector<16x128xf32>
    %c0_2 = arith.constant 0 : index
    %c0_3 = arith.constant 0 : index
    %7 = vector.load %arg2[%c0_2, %c0_3] : memref<16x128xf32, #tpu.memory_space<vmem>>, vector<16x128xf32>
    %8 = arith.subf %7, %6 : vector<16x128xf32>
    %9 = arith.mulf %8, %8 : vector<16x128xf32>
    %c16_i32_4 = arith.constant 16 : i32
    %10 = arith.addi %5, %c16_i32_4 : i32
    %c16_i32_5 = arith.constant 16 : i32
    %11 = arith.cmpi sle, %10, %c16_i32_5 : i32
    %12 = arith.extui %11 : i1 to i32
    %c0_i32_6 = arith.constant 0 : i32
    %13 = arith.cmpi ne, %12, %c0_i32_6 : i32
    scf.if %13 {
      %17 = arith.cmpf one, %6, %6 : vector<16x128xf32>
      %cst = arith.constant dense<true> : vector<16x128xi1>
      %18 = arith.xori %17, %cst : vector<16x128xi1>
      %19 = arith.cmpf one, %9, %9 : vector<16x128xf32>
      %cst_8 = arith.constant dense<true> : vector<16x128xi1>
      %20 = arith.xori %19, %cst_8 : vector<16x128xi1>
      %21 = arith.andi %18, %20 : vector<16x128xi1>
      %cst_9 = arith.constant 0.000000e+00 : f32
      %22 = vector.broadcast %cst_9 : f32 to vector<16x128xf32>
      %23 = arith.select %21, %9, %22 : vector<16x128xi1>, vector<16x128xf32>
      %24 = arith.extui %18 : vector<16x128xi1> to vector<16x128xi32>
      %25 = arith.sitofp %24 : vector<16x128xi32> to vector<16x128xf32>
      %c0_10 = arith.constant 0 : index
      %c0_11 = arith.constant 0 : index
      %c0_12 = arith.constant 0 : index
      %c0_13 = arith.constant 0 : index
      %26 = vector.load %arg4[%c0_10, %c0_11, %c0_12, %c0_13] : memref<1x2x8x128xf32, #tpu.memory_space<vmem>>, vector<1x1x8x128xf32>
      %27 = vector.shape_cast %26 : vector<1x1x8x128xf32> to vector<8x128xf32>
      %28 = vector.shape_cast %25 : vector<16x128xf32> to vector<2x8x128xf32>
      %cst_14 = arith.constant dense<0.000000e+00> : vector<8x128xf32>
      %29 = vector.multi_reduction <add>, %28, %cst_14 [0] : vector<2x8x128xf32> to vector<8x128xf32>
      %30 = arith.addf %27, %29 : vector<8x128xf32>
      %c0_15 = arith.constant 0 : index
      %c0_16 = arith.constant 0 : index
      %c0_17 = arith.constant 0 : index
      %c0_18 = arith.constant 0 : index
      %31 = vector.load %arg4[%c0_15, %c0_16, %c0_17, %c0_18] : memref<1x2x8x128xf32, #tpu.memory_space<vmem>>, vector<1x1x8x128xf32>
      %32 = vector.shape_cast %31 : vector<1x1x8x128xf32> to vector<8x128xf32>
      %33 = vector.shape_cast %30 : vector<8x128xf32> to vector<1x1x8x128xf32>
      tpu.vector_store %arg4[%c0_15, %c0_16, %c0_17, %c0_18], %33 {strides = array<i32>} : memref<1x2x8x128xf32, #tpu.memory_space<vmem>>, vector<1x1x8x128xf32>,
      %c0_19 = arith.constant 0 : index
      %c1 = arith.constant 1 : index
      %c0_20 = arith.constant 0 : index
      %c0_21 = arith.constant 0 : index
      %34 = vector.load %arg4[%c0_19, %c1, %c0_20, %c0_21] : memref<1x2x8x128xf32, #tpu.memory_space<vmem>>, vector<1x1x8x128xf32>
      %35 = vector.shape_cast %34 : vector<1x1x8x128xf32> to vector<8x128xf32>
      %36 = vector.shape_cast %23 : vector<16x128xf32> to vector<2x8x128xf32>
      %cst_22 = arith.constant dense<0.000000e+00> : vector<8x128xf32>
      %37 = vector.multi_reduction <add>, %36, %cst_22 [0] : vector<2x8x128xf32> to vector<8x128xf32>
      %38 = arith.addf %35, %37 : vector<8x128xf32>
      %c0_23 = arith.constant 0 : index
      %c1_24 = arith.constant 1 : index
      %c0_25 = arith.constant 0 : index
      %c0_26 = arith.constant 0 : index
      %39 = vector.load %arg4[%c0_23, %c1_24, %c0_25, %c0_26] : memref<1x2x8x128xf32, #tpu.memory_space<vmem>>, vector<1x1x8x128xf32>
      %40 = vector.shape_cast %39 : vector<1x1x8x128xf32> to vector<8x128xf32>
      %41 = vector.shape_cast %38 : vector<8x128xf32> to vector<1x1x8x128xf32>
      tpu.vector_store %arg4[%c0_23, %c1_24, %c0_25, %c0_26], %41 {strides = array<i32>} : memref<1x2x8x128xf32, #tpu.memory_space<vmem>>, vector<1x1x8x128xf32>,
    } else {
    }
    %true = arith.constant true
    %14 = arith.xori %11, %true : i1
    %15 = arith.extui %14 : i1 to i32
    %c0_i32_7 = arith.constant 0 : i32
    %16 = arith.cmpi ne, %15, %c0_i32_7 : i32
    scf.if %16 {
      %17 = tpu.iota {dimensions = array<i32: 0>} : vector<16x128xi32>
      %18 = vector.broadcast %5 : i32 to vector<16x128xi32>
      %19 = arith.addi %18, %17 : vector<16x128xi32>
      %c16_i32_8 = arith.constant 16 : i32
      %20 = vector.broadcast %c16_i32_8 : i32 to vector<16x128xi32>
      %21 = arith.cmpi slt, %19, %20 : vector<16x128xi32>
      %22 = arith.cmpf one, %6, %6 : vector<16x128xf32>
      %cst = arith.constant dense<true> : vector<16x128xi1>
      %23 = arith.xori %22, %cst : vector<16x128xi1>
      %24 = arith.andi %21, %23 : vector<16x128xi1>
      %25 = arith.cmpf one, %9, %9 : vector<16x128xf32>
      %cst_9 = arith.constant dense<true> : vector<16x128xi1>
      %26 = arith.xori %25, %cst_9 : vector<16x128xi1>
      %27 = arith.andi %24, %26 : vector<16x128xi1>
      %cst_10 = arith.constant 0.000000e+00 : f32
      %28 = vector.broadcast %cst_10 : f32 to vector<16x128xf32>
      %29 = arith.select %27, %9, %28 : vector<16x128xi1>, vector<16x128xf32>
      %30 = arith.extui %24 : vector<16x128xi1> to vector<16x128xi32>
      %31 = arith.sitofp %30 : vector<16x128xi32> to vector<16x128xf32>
      %c0_11 = arith.constant 0 : index
      %c0_12 = arith.constant 0 : index
      %c0_13 = arith.constant 0 : index
      %c0_14 = arith.constant 0 : index
      %32 = vector.load %arg4[%c0_11, %c0_12, %c0_13, %c0_14] : memref<1x2x8x128xf32, #tpu.memory_space<vmem>>, vector<1x1x8x128xf32>
      %33 = vector.shape_cast %32 : vector<1x1x8x128xf32> to vector<8x128xf32>
      %34 = vector.shape_cast %31 : vector<16x128xf32> to vector<2x8x128xf32>
      %cst_15 = arith.constant dense<0.000000e+00> : vector<8x128xf32>
      %35 = vector.multi_reduction <add>, %34, %cst_15 [0] : vector<2x8x128xf32> to vector<8x128xf32>
      %36 = arith.addf %33, %35 : vector<8x128xf32>
      %c0_16 = arith.constant 0 : index
      %c0_17 = arith.constant 0 : index
      %c0_18 = arith.constant 0 : index
      %c0_19 = arith.constant 0 : index
      %37 = vector.load %arg4[%c0_16, %c0_17, %c0_18, %c0_19] : memref<1x2x8x128xf32, #tpu.memory_space<vmem>>, vector<1x1x8x128xf32>
      %38 = vector.shape_cast %37 : vector<1x1x8x128xf32> to vector<8x128xf32>
      %39 = vector.shape_cast %36 : vector<8x128xf32> to vector<1x1x8x128xf32>
      tpu.vector_store %arg4[%c0_16, %c0_17, %c0_18, %c0_19], %39 {strides = array<i32>} : memref<1x2x8x128xf32, #tpu.memory_space<vmem>>, vector<1x1x8x128xf32>,
      %c0_20 = arith.constant 0 : index
      %c1 = arith.constant 1 : index
      %c0_21 = arith.constant 0 : index
      %c0_22 = arith.constant 0 : index
      %40 = vector.load %arg4[%c0_20, %c1, %c0_21, %c0_22] : memref<1x2x8x128xf32, #tpu.memory_space<vmem>>, vector<1x1x8x128xf32>
      %41 = vector.shape_cast %40 : vector<1x1x8x128xf32> to vector<8x128xf32>
      %42 = vector.shape_cast %29 : vector<16x128xf32> to vector<2x8x128xf32>
      %cst_23 = arith.constant dense<0.000000e+00> : vector<8x128xf32>
      %43 = vector.multi_reduction <add>, %42, %cst_23 [0] : vector<2x8x128xf32> to vector<8x128xf32>
      %44 = arith.addf %41, %43 : vector<8x128xf32>
      %c0_24 = arith.constant 0 : index
      %c1_25 = arith.constant 1 : index
      %c0_26 = arith.constant 0 : index
      %c0_27 = arith.constant 0 : index
      %45 = vector.load %arg4[%c0_24, %c1_25, %c0_26, %c0_27] : memref<1x2x8x128xf32, #tpu.memory_space<vmem>>, vector<1x1x8x128xf32>
      %46 = vector.shape_cast %45 : vector<1x1x8x128xf32> to vector<8x128xf32>
      %47 = vector.shape_cast %44 : vector<8x128xf32> to vector<1x1x8x128xf32>
      tpu.vector_store %arg4[%c0_24, %c1_25, %c0_26, %c0_27], %47 {strides = array<i32>} : memref<1x2x8x128xf32, #tpu.memory_space<vmem>>, vector<1x1x8x128xf32>,
    } else {
    }
    return
  }
  func.func @transform_0(%arg0: i32, %arg1: i32) -> (i32, i32) {
    %c1_i32 = arith.constant 1 : i32
    %0 = arith.muli %arg0, %c1_i32 : i32
    %1 = arith.addi %0, %arg1 : i32
    %c0_i32 = arith.constant 0 : i32
    %2 = arith.minsi %1, %c0_i32 : i32
    %c0_i32_0 = arith.constant 0 : i32
    %c0_i32_1 = arith.constant 0 : i32
    return %2, %c0_i32_0 : i32, i32
  }
  func.func @transform_1(%arg0: i32, %arg1: i32) -> (i32, i32) {
    %c1_i32 = arith.constant 1 : i32
    %0 = arith.muli %arg0, %c1_i32 : i32
    %1 = arith.addi %0, %arg1 : i32
    %c0_i32 = arith.constant 0 : i32
    %2 = arith.minsi %1, %c0_i32 : i32
    %c0_i32_0 = arith.constant 0 : i32
    %c0_i32_1 = arith.constant 0 : i32
    return %2, %c0_i32_0 : i32, i32
  }
  func.func @transform_2(%arg0: i32, %arg1: i32) -> (i32, i32, i32, i32) {
    %c0_i32 = arith.constant 0 : i32
    %c0_i32_0 = arith.constant 0 : i32
    %c0_i32_1 = arith.constant 0 : i32
    %c0_i32_2 = arith.constant 0 : i32
    return %arg0, %c0_i32, %c0_i32_0, %c0_i32_1 : i32, i32, i32, i32
  }
}

</mosaic_0001>

<bundles_post_ra>
// kernel: tpu_custom_call.1
= control target key start
LH: loop header
LB: loop body
LE: loop exit
PB: predicated region body
PF: predicated region fallthrough
CT: control target
= control target key end

     0   :  { %7 = vsyncpa [#allocation3], 0  ;;  %s333_s0 = inlined_call_operand.hbm [shape: f32[16,128], index: 0, kind: input, shape index: {}]   ;;  %s334_s1 = inlined_call_operand.hbm [shape: f32[16,128], index: 1, kind: input, shape index: {}]   ;;  %s335_s2 = inlined_call_operand.hbm [shape: f32[1,2,8,128], index: 2, kind: output, shape index: {}]  }
   0x1   :  { %8 = vsyncpa [#allocation6], 0 }
   0x2   :  { %9 = vsyncpa [#allocation4], 0  ;;  %s250_s9 = smov [#allocation2]   ;;  %s178_s13 = scalar_lea.hbm %s333_s0, 256 }
   0x3   :  { %s21_s10 = sshll.u32 %s250_s9, 4  ;;  %p179_p0 = scmp.ne.s32.totalorder %s333_s0, %s178_s13  ;;  %s22_s10 = int_to_ptr.vmem [resolvable:$true] %s21_s10 }
   0x4   :  { %p182_p1 = scmp.lt.u32.totalorder %s178_s13, %s333_s0 }
   0x6   :  { %p184_p2 = pnand %p182_p1, %p179_p0 }
   0x8   :  { %187 = shalt.err (!%p184_p2)
}
   0x9   :  { %s188_s18 = scalar_lea.vmem %s22_s10, 256  ;;  %p193_p4 = scmp.lt.s32.totalorder %s22_s10, %s22_s10 }
   0xa   :  { %p189_p3 = scmp.ne.s32.totalorder %s22_s10, %s188_s18  ;;  %p194_p5 = scmp.lt.s32.totalorder %s188_s18, %s188_s18 }
   0xc   :  { %p195_p6 = por %p194_p5, %p193_p4 }
   0xe   :  { %p196_p7 = pnand %p195_p6, %p189_p3 }
  0x10   :  { %199 = shalt.err (!%p196_p7)
}
  0x11   :  { %s251_s19 = smov 128   ;;  %s252_s20 = smov 8  }
  0x12   :  { %27 = dma.hbm_to_vmem [thread:$0]  %s333_s0, 256, %s22_s10, [#allocation3], %s251_s19, %s251_s19, %s252_s20  }
  0x13   :  { %s253_s23 = smov [#allocation5]   ;;  %s200_s27 = scalar_lea.hbm %s334_s1, 256 }
  0x14   :  { %s39_s24 = sshll.u32 %s253_s23, 4  ;;  %p201_p8 = scmp.ne.s32.totalorder %s334_s1, %s200_s27  ;;  %s40_s24 = int_to_ptr.vmem [resolvable:$true] %s39_s24 }
  0x15   :  { %p204_p9 = scmp.lt.u32.totalorder %s200_s27, %s334_s1 }
  0x17   :  { %p206_p10 = pnand %p204_p9, %p201_p8 }
  0x19   :  { %209 = shalt.err (!%p206_p10)
}
  0x1a   :  { %s210_s4 = scalar_lea.vmem %s40_s24, 256  ;;  %p215_p12 = scmp.lt.s32.totalorder %s40_s24, %s40_s24 }
  0x1b   :  { %p211_p11 = scmp.ne.s32.totalorder %s40_s24, %s210_s4  ;;  %p216_p13 = scmp.lt.s32.totalorder %s210_s4, %s210_s4 }
  0x1d   :  { %p217_p0 = por %p216_p13, %p215_p12 }
  0x1f   :  { %p218_p1 = pnand %p217_p0, %p211_p11 }
  0x21   :  { %221 = shalt.err (!%p218_p1)
}
  0x22   :  { %45 = dma.hbm_to_vmem [thread:$0]  %s334_s1, 256, %s40_s24, [#allocation6], %s251_s19, %s251_s19, %s252_s20  }
  0x23   :  { %244 = dma.done.wait [#allocation3], 256  }
  0x24   :  { %245 = vsyncadd [#allocation3], 4294967040 }
  0x25   :  { %246 = dma.done.wait [#allocation6], 256  }
  0x26   :  { %247 = vsyncadd [#allocation6], 4294967040  ;;  %v68_v0 = vld [vmem:[#allocation5] sm:$0xff]  ;;  %v69_v1 = vld [vmem:[#allocation5 + $0x8] sm:$0xff]  ;;  %vm254_vm2 = vmmov 1   ;;  %v255_v8 = vmov 0.0  }
  0x27   :  { %v70_v2 = vld [vmem:[#allocation2] sm:$0xff]  ;;  %vm81_vm0 = vcmp.ne.f32.partialorder %v68_v0, %v68_v0  ;;  %vm82_vm1 = vcmp.ne.f32.partialorder %v69_v1, %v69_v1  ;;  %v71_v3 = vld [vmem:[#allocation2 + $0x8] sm:$0xff]  ;;  %s256_s1 = smov [#allocation7]  }
  0x28   :  { %v72_v4 = vsub.f32 %v70_v2, %v68_v0  ;;  %vm302_vm3 = vmxor %vm81_vm0, %vm254_vm2  ;;  %v73_v6 = vsub.f32 %v71_v3, %v69_v1  ;;  %s150_s6 = sshll.u32 %s256_s1, 4  ;;  %s151_s6 = int_to_ptr.vmem [resolvable:$true] %s150_s6 }
  0x29   :  { %vm306_vm4 = vmxor %vm82_vm1, %vm254_vm2  ;;  %v167_v9 = vsel %vm302_vm3, 1.0, %v255_v8  ;;  %s222_s7 = scalar_lea.vmem %s151_s6, 256  ;;  %p227_p3 = scmp.lt.s32.totalorder %s151_s6, %s151_s6 }
  0x2a   :  { %v74_v10 = vmul.f32 %v72_v4, %v72_v4  ;;  %v168_v11 = vsel %vm306_vm4, 1.0, %v255_v8  ;;  %v75_v12 = vmul.f32 %v73_v6, %v73_v6  ;;  %p223_p2 = scmp.ne.s32.totalorder %s151_s6, %s222_s7  ;;  %p228_p4 = scmp.lt.s32.totalorder %s222_s7, %s222_s7 }
  0x2b   :  { %v98_v13 = vadd.f32 %v168_v11, %v167_v9 }
  0x2c   :  { %vm85_vm5 = vcmp.ne.f32.partialorder %v74_v10, %v74_v10  ;;  %vm86_vm6 = vcmp.ne.f32.partialorder %v75_v12, %v75_v12  ;;  %p229_p5 = por %p228_p4, %p227_p3 }
  0x2d   :  { %vm87_vm7 = vmxor %vm85_vm5, %vm254_vm2  ;;  %100 = vst [vmem:[#allocation7] sm:$0xff] %v98_v13 }
  0x2e   :  { %vm88_vm8 = vmxor %vm86_vm6, %vm254_vm2  ;;  %p230_p6 = pnand %p229_p5, %p223_p2 }
  0x2f   :  { %vm89_vm9 = vmand %vm302_vm3, %vm87_vm7 }
  0x30   :  { %vm90_vm10 = vmand %vm306_vm4, %vm88_vm8  ;;  %v91_v14 = vsel %vm89_vm9, %v74_v10, 0.0 }
  0x31   :  { %v92_v15 = vsel %vm90_vm10, %v75_v12, 0.0 }
  0x32   :  { %v103_v16 = vadd.f32 %v92_v15, %v91_v14 }
  0x34   :  { %105 = vst [vmem:[#allocation7 + $0x8] sm:$0xff] %v103_v16 }
  0x35   :  { %233 = shalt.err (!%p230_p6)
}
  0x36   :  { %s234_s10 = scalar_lea.hbm %s335_s2, 256 }
  0x37   :  { %p235_p7 = scmp.ne.s32.totalorder %s335_s2, %s234_s10  ;;  %p238_p8 = scmp.lt.u32.totalorder %s234_s10, %s335_s2 }
  0x39   :  { %p240_p9 = pnand %p238_p8, %p235_p7 }
  0x3b   :  { %243 = shalt.err (!%p240_p9)
}
  0x3c   :  { %156 = dma.vmem_to_hbm [thread:$0]  %s151_s6, 256, %s335_s2, [#allocation4], %s251_s19, %s251_s19, %s252_s20  }
  0x3d   :  { %248 = dma.done.wait [#allocation4], 256  }
  0x3e   :  { %249 = vsyncadd [#allocation4], 4294967040 }
  0x3f   :  { %160 = vsyncpa [#allocation3], 1 }
  0x40   :  { %161 = vsyncpa [#allocation6], 1 }
  0x41   :  { %162 = vsyncpa [#allocation4], 1 }

</bundles_post_ra>
